<compile_context>
chip_gen: v7x
topology: tpu7x:2x2x1
jax: 0.10.0
libtpu: 0.0.40
codegen_flags: <defaults>
</compile_context>

<pallas_src>
import functools

import jax
import jax.numpy as jnp
from jax import lax
from jax.experimental import pallas as pl
from jax.experimental.pallas import tpu as pltpu


# ---------------------------------------------------------------------------
# Activations (traced into the kernel body at kernel-construction time).
# ---------------------------------------------------------------------------
def _identity(x):
    return x


def _relu(x):
    return jnp.maximum(x, 0.0)


def _elu(x):
    # PyTorch nn.ELU default alpha=1.0
    return jnp.where(x > 0, x, jnp.expm1(x))


def _sigmoid(x):
    return jax.nn.sigmoid(x)


def _tanh(x):
    return jnp.tanh(x)


def _leaky_relu(x):
    # LeakyRelu in the module uses negative_slope=0.2
    return jnp.where(x > 0, x, 0.2 * x)


ACTIVATION_FUNCTIONS = {
    "none": _identity,
    "relu": _relu,
    "elu": _elu,
    "sigmoid": _sigmoid,
    "tanh": _tanh,
    "leaky_relu": _leaky_relu,
}

_TRANSCENDENTAL_ACTS = {"elu", "sigmoid", "tanh"}


# ---------------------------------------------------------------------------
# Kernel body: one (tm, tn) output tile, reducing over K in grid axis 2.
# ---------------------------------------------------------------------------
def _nonlinear_kernel(x_ref, w_ref, b_ref, o_ref, acc_ref, *, act_fn):
    # x_ref : [tm, tk]   (VMEM)
    # w_ref : [tn, tk]   (VMEM)  -- PyTorch [n_out, n_in] layout, NOT transposed
    # b_ref : [1,  tn]   (VMEM)
    # o_ref : [tm, tn]   (VMEM)
    # acc_ref:[tm, tn]   f32 scratch accumulator, resident across the K axis
    k = pl.program_id(2)

    @pl.when(k == 0)
    def _():
        acc_ref[...] = jnp.zeros_like(acc_ref)

    # Contract the shared tk axis directly (x dim 1 with w dim 1) on the MXU.
    acc_ref[...] += lax.dot_general(
        x_ref[...],
        w_ref[...],
        dimension_numbers=(((1,), (1,)), ((), ())),
        preferred_element_type=jnp.float32,
    )

    # Epilogue: bias + activation fused on the f32 accumulator, last K step only.
    @pl.when(k == pl.num_programs(2) - 1)
    def _():
        acc = acc_ref[...] + b_ref[...].astype(jnp.float32)
        o_ref[...] = act_fn(acc).astype(o_ref.dtype)


# ---------------------------------------------------------------------------
# Wrapper: tiling, padding to lane-dense shapes, pallas_call.
# ---------------------------------------------------------------------------
def _round_up(v, m):
    return ((v + m - 1) // m) * m


def _pick_tile(dim, preferred, align):
    """Choose a tile (multiple of `align`, capped at `preferred`) and the
    padded dim size (a multiple of the tile)."""
    tile = min(preferred, _round_up(dim, align))
    return tile, _round_up(dim, tile)


def nonlinear_forward(x, weight, bias, non_linearity="relu",
                      tm_pref=128, tn_pref=256, tk_pref=256):
    """y = act(x @ weight.T + bias), matching torch.nn.Linear semantics.

    x:      [B, n_in]
    weight: [n_out, n_in]   (PyTorch Linear convention -- not transposed)
    bias:   [n_out]
    """
    act_fn = ACTIVATION_FUNCTIONS[non_linearity]
    B, n_in = x.shape
    n_out, n_in_w = weight.shape
    assert n_in_w == n_in, "weight/input feature mismatch"
    assert bias.shape == (n_out,)

    # Tile sizes: 128-multiples on lane axes (works on v5e's 128-wide MXU and
    # packs cleanly into 256-wide MXUs on v6e/v7x); M aligned to the sublane
    # granule. Tiles stay far below v7x's 64 MiB VMEM even with double
    # buffering: 2*(tm*tk + tn*tk)*4B + tm*tn*4B ~ a few hundred KiB.
    tm, Mp = _pick_tile(B, tm_pref, 8)
    tn, Np = _pick_tile(n_out, tn_pref, 128)
    tk, Kp = _pick_tile(n_in, tk_pref, 128)

    # Pad once to tile multiples. Zero-padding K is a mathematical no-op for
    # the dot product; padded M rows / N cols are sliced away below.
    xp = x if (Mp == B and Kp == n_in) else jnp.pad(
        x, ((0, Mp - B), (0, Kp - n_in)))
    wp = weight if (Np == n_out and Kp == n_in) else jnp.pad(
        weight, ((0, Np - n_out), (0, Kp - n_in)))
    bp = bias if Np == n_out else jnp.pad(bias, (0, Np - n_out))
    bp = bp.reshape(1, Np)  # 2-D for TPU layout, lane-dense

    kernel = functools.partial(_nonlinear_kernel, act_fn=act_fn)

    itemsize = jnp.dtype(x.dtype).itemsize
    cost = pl.CostEstimate(
        flops=2 * Mp * Kp * Np,
        transcendentals=(Mp * Np) if non_linearity in _TRANSCENDENTAL_ACTS else 0,
        bytes_accessed=(xp.size + wp.size + bp.size + Mp * Np) * itemsize,
    )

    out = pl.pallas_call(
        kernel,
        out_shape=jax.ShapeDtypeStruct((Mp, Np), x.dtype),
        grid_spec=pltpu.PrefetchScalarGridSpec(
            num_scalar_prefetch=0,
            grid=(Mp // tm, Np // tn, Kp // tk),
            in_specs=[
                pl.BlockSpec((tm, tk), lambda i, j, k: (i, k)),   # x
                pl.BlockSpec((tn, tk), lambda i, j, k: (j, k)),   # weight [n_out, n_in]
                pl.BlockSpec((1, tn), lambda i, j, k: (0, j)),    # bias
            ],
            out_specs=pl.BlockSpec((tm, tn), lambda i, j, k: (i, j)),
            scratch_shapes=[pltpu.VMEM((tm, tn), jnp.float32)],
        ),
        compiler_params=pltpu.CompilerParams(
            dimension_semantics=("parallel", "parallel", "arbitrary"),
        ),
        cost_estimate=cost,
    )(xp, wp, bp)

    if Mp != B or Np != n_out:
        out = out[:B, :n_out]
    return out


# ---------------------------------------------------------------------------
# Deterministic parameter init mirroring the module's __init__.
# ---------------------------------------------------------------------------
def init_nonlinear_params(key, n_in, n_out, dtype=jnp.float32):
    # xavier_normal_: std = gain * sqrt(2 / (fan_in + fan_out)), gain = 1
    std = (2.0 / (n_in + n_out)) ** 0.5
    weight = std * jax.random.normal(key, (n_out, n_in), dtype=dtype)
    bias = jnp.full((n_out,), 0.1, dtype=dtype)   # bias.data.fill_(0.1)
    return weight, bias


def reference_forward(x, weight, bias, non_linearity):
    act_fn = ACTIVATION_FUNCTIONS[non_linearity]
    y = jnp.dot(x, weight.T, precision=lax.Precision.HIGHEST) + bias[None, :]
    return act_fn(y)


if __name__ == "__main__":
    key = jax.random.PRNGKey(0)
    k_x, k_w = jax.random.split(key)

    # Small but multi-tile shapes (exercises K reduction, N tiling, padding).
    batch, n_in, n_out = 8, 512, 384

    x = jax.random.normal(k_x, (batch, n_in), dtype=jnp.float32)
    weight, bias = init_nonlinear_params(k_w, n_in, n_out)

    ok = True
    for non_linearity in ("leaky_relu", "tanh"):
        y = nonlinear_forward(x, weight, bias, non_linearity)
        y = jax.block_until_ready(y)
        y_ref = reference_forward(x, weight, bias, non_linearity)
        assert y.shape == (batch, n_out)
        ok &= bool(jnp.allclose(y, y_ref, atol=2e-3, rtol=2e-3))

    assert ok, "mismatch vs reference"
    print("KERNEL_OK")
</pallas_src>

<mosaic_0001>
module attributes {stable_mosaic.version = 11 : i64} {
  func.func @_nonlinear_kernel(%arg0: i32, %arg1: i32, %arg2: i32, %arg3: memref<8x256xf32, #tpu.memory_space<vmem>>, %arg4: memref<256x256xf32, #tpu.memory_space<vmem>>, %arg5: memref<1x256xf32, #tpu.memory_space<vmem>>, %arg6: memref<8x256xf32, #tpu.memory_space<vmem>>, %arg7: memref<8x256xf32, #tpu.memory_space<vmem>>) attributes {dimension_semantics = [#tpu.dimension_semantics<parallel>, #tpu.dimension_semantics<parallel>, #tpu.dimension_semantics<arbitrary>], iteration_bounds = array<i64: 1, 2, 2>, scalar_prefetch = 0 : i64, scratch_operands = 1 : i64, tpu.core_type = #tpu.core_type<tc>, window_params = [{transform_indices = @transform_0, window_bounds = array<i64: 8, 256>}, {transform_indices = @transform_1, window_bounds = array<i64: 256, 256>}, {transform_indices = @transform_2, window_bounds = array<i64: 1, 256>}, {transform_indices = @transform_3, window_bounds = array<i64: 8, 256>}]} {
    %c0_i32 = arith.constant 0 : i32
    %0 = arith.cmpi eq, %arg2, %c0_i32 : i32
    %1 = arith.extui %0 : i1 to i32
    %c0_i32_0 = arith.constant 0 : i32
    %2 = arith.cmpi ne, %1, %c0_i32_0 : i32
    scf.if %2 {
      %cst_9 = arith.constant 0.000000e+00 : f32
      %12 = vector.broadcast %cst_9 : f32 to vector<8x256xf32>
      %c0_10 = arith.constant 0 : index
      %c0_11 = arith.constant 0 : index
      %13 = vector.load %arg7[%c0_10, %c0_11] : memref<8x256xf32, #tpu.memory_space<vmem>>, vector<8x256xf32>
      tpu.vector_store %arg7[%c0_10, %c0_11], %12 {strides = array<i32>} : memref<8x256xf32, #tpu.memory_space<vmem>>, vector<8x256xf32>,
    } else {
    }
    %c0 = arith.constant 0 : index
    %c0_1 = arith.constant 0 : index
    %3 = vector.load %arg7[%c0, %c0_1] : memref<8x256xf32, #tpu.memory_space<vmem>>, vector<8x256xf32>
    %c0_2 = arith.constant 0 : index
    %c0_3 = arith.constant 0 : index
    %4 = vector.load %arg3[%c0_2, %c0_3] : memref<8x256xf32, #tpu.memory_space<vmem>>, vector<8x256xf32>
    %c0_4 = arith.constant 0 : index
    %c0_5 = arith.constant 0 : index
    %5 = vector.load %arg4[%c0_4, %c0_5] : memref<256x256xf32, #tpu.memory_space<vmem>>, vector<256x256xf32>
    %cst = arith.constant dense<0.000000e+00> : vector<8x256xf32>
    %6 = tpu.matmul %4, %5, %cst {dimension_numbers = #tpu.dot_dimension_numbers<[1], [1], [0], [0], [0, 0, 1, 0], [], []>} : vector<8x256xf32>, vector<256x256xf32>, vector<8x256xf32> -> vector<8x256xf32>
    %7 = arith.addf %3, %6 : vector<8x256xf32>
    %c0_6 = arith.constant 0 : index
    %c0_7 = arith.constant 0 : index
    %8 = vector.load %arg7[%c0_6, %c0_7] : memref<8x256xf32, #tpu.memory_space<vmem>>, vector<8x256xf32>
    tpu.vector_store %arg7[%c0_6, %c0_7], %7 {strides = array<i32>} : memref<8x256xf32, #tpu.memory_space<vmem>>, vector<8x256xf32>,
    %c1_i32 = arith.constant 1 : i32
    %9 = arith.cmpi eq, %arg2, %c1_i32 : i32
    %10 = arith.extui %9 : i1 to i32
    %c0_i32_8 = arith.constant 0 : i32
    %11 = arith.cmpi ne, %10, %c0_i32_8 : i32
    scf.if %11 {
      %c0_9 = arith.constant 0 : index
      %c0_10 = arith.constant 0 : index
      %12 = vector.load %arg7[%c0_9, %c0_10] : memref<8x256xf32, #tpu.memory_space<vmem>>, vector<8x256xf32>
      %c0_11 = arith.constant 0 : index
      %c0_12 = arith.constant 0 : index
      %13 = vector.load %arg5[%c0_11, %c0_12] : memref<1x256xf32, #tpu.memory_space<vmem>>, vector<1x256xf32>
      %14 = vector.broadcast %13 : vector<1x256xf32> to vector<8x256xf32>
      %15 = arith.addf %12, %14 : vector<8x256xf32>
      %cst_13 = arith.constant 0.000000e+00 : f32
      %16 = vector.broadcast %cst_13 : f32 to vector<8x256xf32>
      %17 = arith.cmpf ogt, %15, %16 : vector<8x256xf32>
      %cst_14 = arith.constant 2.000000e-01 : f32
      %18 = vector.broadcast %cst_14 : f32 to vector<8x256xf32>
      %19 = arith.mulf %18, %15 : vector<8x256xf32>
      %20 = arith.select %17, %15, %19 : vector<8x256xi1>, vector<8x256xf32>
      %c0_15 = arith.constant 0 : index
      %c0_16 = arith.constant 0 : index
      %21 = vector.load %arg6[%c0_15, %c0_16] : memref<8x256xf32, #tpu.memory_space<vmem>>, vector<8x256xf32>
      tpu.vector_store %arg6[%c0_15, %c0_16], %20 {strides = array<i32>} : memref<8x256xf32, #tpu.memory_space<vmem>>, vector<8x256xf32>,
    } else {
    }
    return
  }
  func.func @transform_0(%arg0: i32, %arg1: i32, %arg2: i32) -> (i32, i32) {
    %c0_i32 = arith.constant 0 : i32
    return %arg0, %arg2 : i32, i32
  }
  func.func @transform_1(%arg0: i32, %arg1: i32, %arg2: i32) -> (i32, i32) {
    %c0_i32 = arith.constant 0 : i32
    return %arg1, %arg2 : i32, i32
  }
  func.func @transform_2(%arg0: i32, %arg1: i32, %arg2: i32) -> (i32, i32) {
    %c0_i32 = arith.constant 0 : i32
    %c0_i32_0 = arith.constant 0 : i32
    return %c0_i32, %arg1 : i32, i32
  }
  func.func @transform_3(%arg0: i32, %arg1: i32, %arg2: i32) -> (i32, i32) {
    %c0_i32 = arith.constant 0 : i32
    return %arg0, %arg1 : i32, i32
  }
}

</mosaic_0001>

<bundles_post_ra>
// kernel: tpu_custom_call.1
= control target key start
LH: loop header
LB: loop body
LE: loop exit
PB: predicated region body
PF: predicated region fallthrough
CT: control target
= control target key end

     0   :  { %s1490_s0 = inlined_call_operand.hbm [shape: f32[8,512], index: 0, kind: input, shape index: {}]   ;;  %s1491_s1 = inlined_call_operand.hbm [shape: f32[512,512], index: 1, kind: input, shape index: {}]   ;;  %s1492_s2 = inlined_call_operand.vmem [shape: f32[1,512], index: 2, kind: input, shape index: {}]   ;;  %s1493_s3 = inlined_call_operand.hbm [shape: f32[8,512], index: 3, kind: output, shape index: {}]  }
   0x1   :  { %1502 = sst [smem:[#allocation20_spill]] %s1490_s0 }
   0x2   :  { %8 = vsyncpa [#allocation4], 0 }
   0x3   :  { %10 = vsyncpa [#allocation4 + $0x1], 0 }
   0x4   :  { %11 = vsyncpa [#allocation7], 0 }
   0x5   :  { %13 = vsyncpa [#allocation7 + $0x1], 0 }
   0x6   :  { %14 = vsyncpa [#allocation5], 0 }
   0x7   :  { %16 = vsyncpa [#allocation5 + $0x1], 0  ;;  %s1064_s12 = smov 0   ;;  %s1066_s13 = smov 0  }
   0x8   :  { %s1068_s14 = smov 0   ;;  %s1070_s15 = smov 0  }
   0x9   :  { %s1072_s16 = smov 0   ;;  %s1074_s17 = smov 0  }
   0xa   :  { %s1076_s18 = smov 0   ;;  %s1078_s19 = smov 0  }
   0xb   :  { %s1080_s20 = smov 0   ;;  %s1082_s21 = smov 0  }
   0xc   :  { %s1084_s22 = smov 0   ;;  %s1086_s23 = smov 0  }
   0xd   :  { %s1088_s24 = smov 0   ;;  %s1090_s25 = smov 0  }
   0xe LB: > { %1503 = sst [smem:[#allocation12_spill]] %s991_s14  ;;  %s599_s26 = sadd.s32 4294967295, %s1035_s25   ;;  %s1035_s25 = sphi %s1090_s25, %s22_s25   ;;  %s1031_s24 = sphi %s1088_s24, %s1537_s24   ;;  %s1027_s23 = sphi %s1086_s23, %s1547_s23   ;;  %s1023_s22 = sphi %s1084_s22, %s1535_s22   ;;  %s1019_s21 = sphi %s1082_s21, %s1546_s21   ;;  %s1015_s20 = sphi %s1080_s20, %s1534_s20   ;;  %s1011_s19 = sphi %s1078_s19, %s1545_s19   ;;  %s1007_s18 = sphi %s1076_s18, %s1544_s18   ;;  %s1003_s17 = sphi %s1074_s17, %s1543_s17   ;;  %s999_s16 = sphi %s1072_s16, %s1542_s16   ;;  %s995_s15 = sphi %s1070_s15, %s1541_s15   ;;  %s991_s14 = sphi %s1068_s14, %s1531_s14   ;;  %s987_s13 = sphi %s1066_s13, %s1540_s13   ;;  %s983_s12 = sphi %s1064_s12, %s1539_s12  }
   0xf   : > { %1504 = sst [smem:[#allocation13_spill]] %s1015_s20  ;;  %s34_s28 = sadd.s32 1, %s1027_s23 }
  0x10   : > { %1505 = sst [smem:[#allocation14_spill]] %s1031_s24  ;;  %s37_s29 = sadd.s32 1, %s1031_s24 }
  0x11   : > { %p35_p0 = scmp.ge.s32.totalorder %s34_s28, 2  ;;  %s50_s30 = sadd.s32 1, %s1015_s20 }
  0x12   : > { %p57_p1 = scmp.ne.s32.totalorder %s1015_s20, %s1011_s19  ;;  %p58_p2 = scmp.eq.s32.totalorder %s1035_s25, 0 }
  0x13   : > { %s1549_s28 = smov (%p35_p0, %s34_s28), 0  ;;  %s1551_s29 = smov (!%p35_p0, %s37_s29), %s1031_s24 }
  0x14   : > { %1506 = sst [smem:[#allocation15_spill]] %s1549_s28  ;;  %s46_s4 = ssub.s32 %s1027_s23, %s1549_s28 }
  0x15   : > { %p1147_p3 = por %p58_p2, %p57_p1  ;;  %p39_p4 = scmp.ge.s32.totalorder %s1551_s29, 2 }
  0x16   : > { %p48_p5 = scmp.eq.s32.totalorder %s46_s4, 0  ;;  %p63_p6 = scmp.ne.s32.totalorder %s1011_s19, %s1007_s18 }
  0x17   : > { %p1154_p7 = scmp.eq.s32.totalorder %s599_s26, 0  ;;  %s1553_s29 = smov (%p39_p4, %s1551_s29), 0 }
  0x18   : > { %1509 = sst [smem:[#allocation16_spill]] %s1553_s29  ;;  %s73_s9 = ssub.s32 %s1031_s24, %s1553_s29 }
  0x19   : > { %s1161_s7 = scalar_select %p48_p5, %s1015_s20, %s50_s30  }
  0x1a   : > { %p1165_p8 = por %p1154_p7, %p63_p6  ;;  %s75_s10 = sor.u32 %s73_s9, %s46_s4 }
  0x1b   : > { %1510 = sst [smem:[#allocation17_spill]] %s1161_s7  ;;  %s78_s11 = sadd.s32 1, %s1003_s17 }
  0x1c   : > { %s1511_s8 = scalar_select %p1165_p8, 1, 0 }
  0x1d   : > { %p76_p9 = scmp.eq.s32.totalorder %s75_s10, 0  ;;  %p85_p10 = scmp.ne.s32.totalorder %s1003_s17, %s999_s16 }
  0x1e   : > { %p91_p11 = scmp.ne.s32.totalorder %s999_s16, %s995_s15  ;;  %p130_p12 = scmp.eq.s32.totalorder %s73_s9, 0 }
  0x1f   : > { %s1177_s18 = scalar_select %p76_p9, %s1003_s17, %s78_s11  }
  0x20   : > { %p1181_p13 = por %p85_p10, %p58_p2  ;;  %p1187_p0 = por %p91_p11, %p1154_p7 }
  0x21   : > { %1512 = sst [smem:[#allocation18_spill]] %s1177_s18  ;;  %s132_s4 = sadd.s32 1, %s991_s14 }
  0x22   : > { %s1514_s27 = scalar_select %p1187_p0, 1, 0 }
  0x23   : > { %p142_p1 = scmp.ne.s32.totalorder %s991_s14, %s987_s13  ;;  %p143_p4 = scmp.eq.s32.totalorder %s599_s26, 3 }
  0x24   : > { %s1195_s10 = scalar_select %p130_p12, %s991_s14, %s132_s4  }
  0x25   : > { %p148_p5 = scmp.ne.s32.totalorder %s987_s13, %s983_s12  ;;  %s1516_s15 = sadd.s32 4294967294, %s1035_s25  }
  0x26   : > { %1515 = sst [smem:[#allocation19_spill]] %s1195_s10  ;;  %p149_p2 = scmp.eq.s32.totalorder %s1516_s15, 3 }
  0x27   : > { %p1203_p6 = por %p143_p4, %p142_p1  ;;  %p707_p7 = scmp.lt.s32.totalorder %s1035_s25, 4 }
  0x28   : > { %p1208_p9 = por %p149_p2, %p148_p5  ;;  %s169_s11 = sand.u32 1, %s1015_s20  }
  0x29   : > { %s1517_s9 = scalar_select %p1203_p6, 1, 0 }
  0x2a   : > { %s1518_s6 = scalar_select %p1208_p9, 1, 0 }
  0x2b   : > { %s603_s29 = sshll.u32 %s169_s11, 4  ;;  %s623_s4 = sshll.u32 %s1027_s23, 8 }
  0x2c   : > { %s1519_s0 = sld [smem:[#allocation20_spill]]  ;;  %s173_s15 = scalar_lea.vmem [#allocation3], %s603_s29 }
  0x2d   : > { %s183_s18 = sshll.u32 %s173_s15, 4  ;;  %p1223_p10 = pnand %p707_p7, %p1147_p3  ;;  %s1219_s18 = int_to_ptr.vmem [resolvable:$true] %s183_s18 }
  0x2e   : > { %p1230_p11 = pnand %p707_p7, %p1181_p13  ;;  %s170_s7 = scalar_lea.sflag [#allocation4], %s169_s11 }
  0x2f   : > { %p827_p4 = pneg %p1223_p10 }
  0x32   : > { %s1217_s26 = scalar_lea.hbm %s1519_s0, %s623_s4  ;;  %s830_s15 = scalar_lea.hbm %s1519_s0, 512 }
  0x33   : > { %s825_s29 = scalar_lea.hbm %s1217_s26, 256  ;;  %p831_p13 = scmp.lt.u32.totalorder %s1217_s26, %s1519_s0 }
  0x34   : > { %p826_p1 = scmp.ne.s32.totalorder %s1217_s26, %s825_s29  ;;  %p832_p2 = scmp.lt.u32.totalorder %s830_s15, %s825_s29 }
  0x35   : > { %p834_p12 = scmp.lt.u32.totalorder %s825_s29, %s1217_s26 }
  0x36   : > { %p828_p3 = pnand %p827_p4, %p826_p1  ;;  %p833_p7 = por %p832_p2, %p831_p13 }
  0x38   : > { %p829_p5 = pneg %p828_p3  ;;  %p835_p9 = por %p834_p12, %p833_p7 }
  0x3a   : > { %p836_p6 = pnand %p835_p9, %p829_p5 }
  0x3c   : > { %839 = shalt.err (!%p836_p6)
}
  0x3d   : > { %s840_s11 = scalar_lea.vmem %s1219_s18, 256  ;;  %s1037_s5 = smov [#allocation3]  }
  0x3e   : > { %p841_p1 = scmp.ne.s32.totalorder %s1219_s18, %s840_s11  ;;  %s845_s4 = sshll.u32 %s1037_s5, 4  ;;  %s846_s4 = int_to_ptr.vmem [resolvable:$false] %s845_s4 }
  0x3f   : > { %s847_s20 = scalar_lea.vmem %s846_s4, 512  ;;  %p848_p8 = scmp.lt.s32.totalorder %s1219_s18, %s846_s4 }
  0x40   : > { %p843_p3 = pnand %p841_p1, %p827_p4  ;;  %p849_p13 = scmp.lt.s32.totalorder %s847_s20, %s840_s11 }
  0x42   : > { %p844_p0 = pneg %p843_p3  ;;  %p850_p2 = por %p849_p13, %p848_p8 }
  0x44   : > { %p851_p12 = pnand %p850_p2, %p844_p0 }
  0x46   : > { %854 = shalt.err (!%p851_p12)
}
  0x47   : > { %699 = dma.hbm_to_vmem [thread:$0]  (!%p1223_p10), %s1217_s26, 256, %s1219_s18, %s170_s7  }
  0x48   : > { %p220_p6 = scmp.lt.s32.totalorder %s1035_s25, 5  ;;  %s190_s29 = sand.u32 1, %s1003_s17  }
  0x49   : > { %s624_s15 = sshll.u32 %s1031_s24, 7  ;;  %p1522_p9 = scmp.ge.s32.totalorder %s1035_s25, 1 }
  0x4a   : > { %s606_s11 = sshll.u32 %s190_s29, 9  ;;  %s1524_s10 = sshll.u32 %s1027_s23, 1 }
  0x4b   : > { %p1265_p4 = pnand %p1522_p9, %p220_p6  ;;  %s201_s5 = sadd.s32 %s624_s15, %s1524_s10 }
  0x4c   : > { %s610_s4 = sshll.u32 %s201_s5, 7  ;;  %s194_s18 = scalar_lea.vmem [#allocation6], %s606_s11 }
  0x4d   : > { %s1274_s14 = scalar_lea.hbm %s1491_s1, %s610_s4  ;;  %s204_s26 = sshll.u32 %s194_s18, 4  ;;  %s1276_s26 = int_to_ptr.vmem [resolvable:$true] %s204_s26 }
  0x4e   : > { %s1278_s7 = scalar_lea.sflag [#allocation7], %s190_s29  ;;  %s855_s24 = scalar_lea.hbm %s1274_s14, 8192 }
  0x4f   : > { %p856_p8 = scmp.ne.s32.totalorder %s1274_s14, %s855_s24  ;;  %p857_p0 = pneg %p1230_p11 }
  0x50   : > { %s860_s10 = scalar_lea.hbm %s1491_s1, 32768  ;;  %p861_p7 = scmp.lt.u32.totalorder %s1274_s14, %s1491_s1 }
  0x51   : > { %p858_p10 = pnand %p857_p0, %p856_p8  ;;  %p862_p1 = scmp.lt.u32.totalorder %s860_s10, %s855_s24 }
  0x52   : > { %p864_p13 = scmp.lt.u32.totalorder %s855_s24, %s1274_s14 }
  0x53   : > { %p859_p5 = pneg %p858_p10  ;;  %p863_p3 = por %p862_p1, %p861_p7 }
  0x55   : > { %p865_p2 = por %p864_p13, %p863_p3 }
  0x57   : > { %p866_p12 = pnand %p865_p2, %p859_p5 }
  0x59   : > { %869 = shalt.err (!%p866_p12)
}
  0x5a   : > { %s870_s29 = scalar_lea.vmem %s1276_s26, 8192  ;;  %s1038_s11 = smov [#allocation6]  }
  0x5b   : > { %p871_p6 = scmp.ne.s32.totalorder %s1276_s26, %s870_s29  ;;  %s875_s20 = sshll.u32 %s1038_s11, 4  ;;  %s876_s20 = int_to_ptr.vmem [resolvable:$false] %s875_s20 }
  0x5c   : > { %s877_s18 = scalar_lea.vmem %s876_s20, 16384  ;;  %p878_p10 = scmp.lt.s32.totalorder %s1276_s26, %s876_s20 }
  0x5d   : > { %p873_p9 = pnand %p871_p6, %p857_p0  ;;  %p879_p7 = scmp.lt.s32.totalorder %s877_s18, %s870_s29 }
  0x5f   : > { %p874_p8 = pneg %p873_p9  ;;  %p880_p1 = por %p879_p7, %p878_p10 }
  0x61   : > { %p881_p3 = pnand %p880_p1, %p874_p8 }
  0x63   : > { %884 = shalt.err (!%p881_p3)
}
  0x64   : > { %s1039_s24 = smov 512   ;;  %s1040_s0 = smov 256  }
  0x65   : > { %s1041_s15 = smov 16   ;;  %224 = sbr.rel (%p1265_p4) target bundleno = 509 (0x1fd), region = 32 }
  0x66   : > { %702 = dma.hbm_to_vmem [thread:$0]  (!%p1230_p11), %s1274_s14, 8192, %s1276_s26, %s1278_s7, %s1039_s24, %s1040_s0, %s1041_s15  }
  0x67   : > { %s226_s10 = sand.u32 (!%p1265_p4), 1, %s1011_s19   ;;  %p1525_p0 = scmp.ne.s32.totalorder (!%p1265_p4), %s1511_s8, 0 }
  0x68   : > { %s1309_s5 = sshll.u32 (!%p1265_p4), %s226_s10, 4  ;;  %s227_s4 = scalar_lea.sflag (!%p1265_p4), [#allocation4], %s226_s10 }
  0x69   : > { %s230_s29 = scalar_lea.vmem (!%p1265_p4), [#allocation3], %s1309_s5 }
  0x6c   : > { %970 = dma.done.wait (%p1525_p0), %s227_s4, 256  }
  0x6d   : > { %972 = vsyncadd (%p1525_p0), %s227_s4, 4294967040  ;;  %s235_s28 = sand.u32 1, %s999_s16   ;;  %p1526_p11 = scmp.ne.s32.totalorder %s1514_s27, 0 }
  0x6e   : > { %s613_s14 = sshll.u32 %s235_s28, 9  ;;  %s236_s26 = scalar_lea.sflag [#allocation7], %s235_s28 }
  0x6f   : > { %s1317_s30 = scalar_lea.vmem [#allocation6], %s613_s14 }
  0x70   : > { %974 = dma.done.wait (%p1526_p11), %s236_s26, 8192  }
  0x71   : > { %976 = vsyncadd (%p1526_p11), %s236_s26, 4294959104  ;;  %s268_s7 = sand.u32 1, %s987_s13   ;;  %s615_s11 = sshll.u32 %s1023_s22, 1 }
  0x72   : > { %s614_s8 = sshll.u32 %s268_s7, 4  ;;  %p275_p4 = scmp.lt.s32.totalorder %s615_s11, 3 }
  0x73   : > { %s1333_s0 = scalar_lea.vmem [#allocation8], %s614_s8  ;;  %p616_p5 = scmp.ne.s32.totalorder %s1019_s21, 0 }
  0x74   : > { %s1555_s11 = smov (!%p275_p4, %s615_s11), 3  ;;  %v1042_v0 = vmov (!%p616_p5), 0.0  }
  0x75   : > { %s277_s24 = scalar_lea.vmem %s1492_s2, %s1555_s11  ;;  %283 = sbr.rel (%p616_p5) target bundleno = 124 (0x7c), region = 44  ;;  %284 = vst [vmem:[#allocation2] sm:$0xff] (!%p616_p5), %v1042_v0  ;;  %285 = vst [vmem:[#allocation2 + $0x8] sm:$0xff] (!%p616_p5), %v1042_v0 }
  0x7c PF: > { %v291_v1 = vld [vmem:[%s1317_s30 + $0x8] sm:$0xff]  ;;  %v293_v2 = vld [vmem:[%s1317_s30 + $0x18] sm:$0xff]  ;;  %v290_v3 = vld [vmem:[%s1317_s30] sm:$0xff]  ;;  %p617_p13 = scmp.ne.s32.totalorder %s1019_s21, 1 }
  0x7d   : > { %v626_v4 = vpack.c.bf16 %v293_v2, %v291_v1  ;;  %v292_v5 = vld [vmem:[%s1317_s30 + $0x10] sm:$0xff]  ;;  %v295_v6 = vld [vmem:[%s1317_s30 + $0x28] sm:$0xff]  ;;  %v297_v7 = vld [vmem:[%s1317_s30 + $0x38] sm:$0xff] }
  0x7e   : > { %v628_v8 = vpack.c.bf16 %v292_v5, %v290_v3  ;;  %v630_v9 = vpack.c.bf16 %v297_v7, %v295_v6  ;;  %v294_v10 = vld [vmem:[%s1317_s30 + $0x20] sm:$0xff]  ;;  %v296_v11 = vld [vmem:[%s1317_s30 + $0x30] sm:$0xff]  ;;  %v299_v12 = vld [vmem:[%s1317_s30 + $0x48] sm:$0xff] }
  0x7f   : > { %627 = vmatprep.subr.bf16.mxu0 %v626_v4  ;;  %v301_v13 = vld [vmem:[%s1317_s30 + $0x58] sm:$0xff]  ;;  %v632_v14 = vpack.c.bf16 %v296_v11, %v294_v10  ;;  %v298_v16 = vld [vmem:[%s1317_s30 + $0x40] sm:$0xff]  ;;  %v300_v17 = vld [vmem:[%s1317_s30 + $0x50] sm:$0xff] }
  0x80   : > { %629 = vmatpush1.bf16.xpose.msra.mxu0 %v628_v8  ;;  %v634_v15 = vpack.c.bf16 %v301_v13, %v299_v12  ;;  %v303_v18 = vld [vmem:[%s1317_s30 + $0x68] sm:$0xff]  ;;  %v305_v19 = vld [vmem:[%s1317_s30 + $0x78] sm:$0xff]  ;;  %v636_v20 = vpack.c.bf16 %v300_v17, %v298_v16  ;;  %v302_v22 = vld [vmem:[%s1317_s30 + $0x60] sm:$0xff] }
  0x81   : > { %631 = vmatprep.subr.bf16.mxu0 %v630_v9  ;;  %v638_v21 = vpack.c.bf16 %v305_v19, %v303_v18  ;;  %v304_v23 = vld [vmem:[%s1317_s30 + $0x70] sm:$0xff]  ;;  %v289_v24 = vld [vmem:[%s230_s29 + $0x8] sm:$0xff]  ;;  %v306_v29 = vld [vmem:[%s1317_s30 + $0x80] sm:$0xff] }
  0x82   : > { %v307_v25 = vld [vmem:[%s1317_s30 + $0x88] sm:$0xff]  ;;  %v309_v26 = vld [vmem:[%s1317_s30 + $0x98] sm:$0xff]  ;;  %418 = vmatprep.mubr.f32.mxu0 %v289_v24  ;;  %v640_v27 = vpack.c.bf16 %v304_v23, %v302_v22  ;;  %v308_v30 = vld [vmem:[%s1317_s30 + $0x90] sm:$0xff] }
  0x83   : > { %v642_v28 = vpack.c.bf16 %v309_v26, %v307_v25  ;;  %v311_v31 = vld [vmem:[%s1317_s30 + $0xa8] sm:$0xff]  ;;  %v313_v32 = vld [vmem:[%s1317_s30 + $0xb8] sm:$0xff]  ;;  %v644_v33 = vpack.c.bf16 %v308_v30, %v306_v29  ;;  %v310_v35 = vld [vmem:[%s1317_s30 + $0xa0] sm:$0xff] }
  0x84   : > { %v646_v34 = vpack.c.bf16 %v313_v32, %v311_v31  ;;  %v312_v36 = vld [vmem:[%s1317_s30 + $0xb0] sm:$0xff]  ;;  %v315_v37 = vld [vmem:[%s1317_s30 + $0xc8] sm:$0xff]  ;;  %v317_v38 = vld [vmem:[%s1317_s30 + $0xd8] sm:$0xff] }
  0x85   : > { %v648_v39 = vpack.c.bf16 %v312_v36, %v310_v35  ;;  %v650_v40 = vpack.c.bf16 %v317_v38, %v315_v37  ;;  %v314_v41 = vld [vmem:[%s1317_s30 + $0xc0] sm:$0xff]  ;;  %v316_v42 = vld [vmem:[%s1317_s30 + $0xd0] sm:$0xff]  ;;  %v319_v43 = vld [vmem:[%s1317_s30 + $0xe8] sm:$0xff] }
  0x86   : > { %v321_v44 = vld [vmem:[%s1317_s30 + $0xf8] sm:$0xff]  ;;  %v652_v45 = vpack.c.bf16 %v316_v42, %v314_v41  ;;  %v318_v47 = vld [vmem:[%s1317_s30 + $0xe0] sm:$0xff]  ;;  %v320_v48 = vld [vmem:[%s1317_s30 + $0xf0] sm:$0xff]  ;;  %v437_v41 = vlaneseq (!%p617_p13) }
  0x87   : > { %v654_v46 = vpack.c.bf16 %v321_v44, %v319_v43  ;;  %v323_v49 = vld [vmem:[%s1317_s30 + $0x108] sm:$0xff]  ;;  %v325_v50 = vld [vmem:[%s1317_s30 + $0x118] sm:$0xff]  ;;  %v656_v51 = vpack.c.bf16 %v320_v48, %v318_v47  ;;  %v322_v53 = vld [vmem:[%s1317_s30 + $0x100] sm:$0xff] }
  0x88   : > { %633 = vmatpush1.bf16.xpose.msra.mxu0 %v632_v14  ;;  %v658_v52 = vpack.c.bf16 %v325_v50, %v323_v49  ;;  %v324_v54 = vld [vmem:[%s1317_s30 + $0x110] sm:$0xff]  ;;  %v327_v55 = vld [vmem:[%s1317_s30 + $0x128] sm:$0xff]  ;;  %v329_v56 = vld [vmem:[%s1317_s30 + $0x138] sm:$0xff]  ;;  %v438_v42 = vshrl.u32 (!%p617_p13), %v437_v41, 7 }
  0x89   : > { %635 = vmatprep.subr.bf16.mxu0 %v634_v15  ;;  %v660_v57 = vpack.c.bf16 %v324_v54, %v322_v53  ;;  %v662_v58 = vpack.c.bf16 %v329_v56, %v327_v55  ;;  %v326_v59 = vld [vmem:[%s1317_s30 + $0x120] sm:$0xff]  ;;  %v328_v60 = vld [vmem:[%s1317_s30 + $0x130] sm:$0xff]  ;;  %v331_v61 = vld [vmem:[%s1317_s30 + $0x148] sm:$0xff] }
  0x8a   : > { %v333_v62 = vld [vmem:[%s1317_s30 + $0x158] sm:$0xff]  ;;  %v664_v63 = vpack.c.bf16 %v328_v60, %v326_v59  ;;  %v330_v1 = vld [vmem:[%s1317_s30 + $0x140] sm:$0xff]  ;;  %v332_v2 = vld [vmem:[%s1317_s30 + $0x150] sm:$0xff]  ;;  %v439_v44 = vsub.s32 (!%p617_p13), 0, %v438_v42 }
  0x8b   : > { %v666_v0 = vpack.c.bf16 %v333_v62, %v331_v61  ;;  %v335_v3 = vld [vmem:[%s1317_s30 + $0x168] sm:$0xff]  ;;  %v337_v4 = vld [vmem:[%s1317_s30 + $0x178] sm:$0xff]  ;;  %v668_v5 = vpack.c.bf16 %v332_v2, %v330_v1  ;;  %v334_v7 = vld [vmem:[%s1317_s30 + $0x160] sm:$0xff] }
  0x8c   : > { %v670_v6 = vpack.c.bf16 %v337_v4, %v335_v3  ;;  %v336_v8 = vld [vmem:[%s1317_s30 + $0x170] sm:$0xff]  ;;  %v339_v9 = vld [vmem:[%s1317_s30 + $0x188] sm:$0xff]  ;;  %v341_v10 = vld [vmem:[%s1317_s30 + $0x198] sm:$0xff] }
  0x8d   : > { %v672_v11 = vpack.c.bf16 %v336_v8, %v334_v7  ;;  %v674_v12 = vpack.c.bf16 %v341_v10, %v339_v9  ;;  %v338_v13 = vld [vmem:[%s1317_s30 + $0x180] sm:$0xff]  ;;  %v340_v14 = vld [vmem:[%s1317_s30 + $0x190] sm:$0xff]  ;;  %v343_v15 = vld [vmem:[%s1317_s30 + $0x1a8] sm:$0xff] }
  0x8e   : > { %v345_v16 = vld [vmem:[%s1317_s30 + $0x1b8] sm:$0xff]  ;;  %v676_v17 = vpack.c.bf16 %v340_v14, %v338_v13  ;;  %v342_v19 = vld [vmem:[%s1317_s30 + $0x1a0] sm:$0xff]  ;;  %v348_v26 = vld [vmem:[%s1317_s30 + $0x1d0] sm:$0xff] }
  0x8f   : > { %v678_v18 = vpack.c.bf16 %v345_v16, %v343_v15  ;;  %v349_v22 = vld [vmem:[%s1317_s30 + $0x1d8] sm:$0xff]  ;;  %v346_v25 = vld [vmem:[%s1317_s30 + $0x1c0] sm:$0xff]  ;;  %v352_v32 = vld [vmem:[%s1317_s30 + $0x1f0] sm:$0xff] }
  0x90   : > { %637 = vmatpush1.bf16.xpose.msra.mxu0 %v636_v20  ;;  %v344_v20 = vld [vmem:[%s1317_s30 + $0x1b0] sm:$0xff]  ;;  %v684_v29 = vpack.c.bf16 %v348_v26, %v346_v25  ;;  %v350_v31 = vld [vmem:[%s1317_s30 + $0x1e0] sm:$0xff]  ;;  %v287_v36 = vld [vmem:[#allocation2 + $0x8] sm:$0xff] }
  0x91   : > { %639 = vmatprep.subr.bf16.mxu0 %v638_v21  ;;  %v347_v21 = vld [vmem:[%s1317_s30 + $0x1c8] sm:$0xff]  ;;  %v680_v23 = vpack.c.bf16 %v344_v20, %v342_v19  ;;  %v286_v35 = vld [vmem:[#allocation2] sm:$0xff] }
  0x92   : > { %v682_v24 = vpack.c.bf16 %v349_v22, %v347_v21  ;;  %v435_v43 = vld [vmem:[%s277_s24] sm:$0x3] (!%p617_p13) }
  0x93   : > { %v440_v48 = vrot.slane (!%p617_p13), %v435_v43, %v439_v44 }
  0x98   : > { %641 = vmatpush1.bf16.xpose.msra.mxu0 %v640_v27  ;;  %v351_v27 = vld [vmem:[%s1317_s30 + $0x1e8] sm:$0xff] }
  0x99   : > { %643 = vmatprep.subr.bf16.mxu0 %v642_v28  ;;  %v353_v28 = vld [vmem:[%s1317_s30 + $0x1f8] sm:$0xff] }
  0x9a   : > { %v686_v30 = vpack.c.bf16 %v353_v28, %v351_v27 }
  0xa0   : > { %645 = vmatpush1.bf16.xpose.msra.mxu0 %v644_v33  ;;  %v688_v33 = vpack.c.bf16 %v352_v32, %v350_v31 }
  0xa1   : > { %647 = vmatprep.subr.bf16.mxu0 %v646_v34  ;;  %v288_v34 = vld [vmem:[%s230_s29] sm:$0xff] }
  0xa8   : > { %649 = vmatpush1.bf16.xpose.msra.mxu0 %v648_v39 }
  0xa9   : > { %651 = vmatprep.subr.bf16.mxu0 %v650_v40 }
  0xb0   : > { %653 = vmatpush1.bf16.xpose.msra.mxu0 %v652_v45  ;;  %v443_v45 = vsub.s32 (!%p617_p13), 1, %v438_v42 }
  0xb1   : > { %655 = vmatprep.subr.bf16.mxu0 %v654_v46 }
  0xb2   : > { %v444_v49 = vrot.slane (!%p617_p13), %v435_v43, %v443_v45 }
  0xb8   : > { %657 = vmatpush1.bf16.xpose.msra.mxu0 %v656_v51 }
  0xb9   : > { %659 = vmatprep.subr.bf16.mxu0 %v658_v52 }
  0xc0   : > { %661 = vmatpush1.bf16.xpose.msra.mxu0 %v660_v57 }
  0xc1   : > { %663 = vmatprep.subr.bf16.mxu0 %v662_v58 }
  0xc8   : > { %665 = vmatpush1.bf16.xpose.msra.mxu0 %v664_v63 }
  0xc9   : > { %667 = vmatprep.subr.bf16.mxu0 %v666_v0 }
  0xd0   : > { %669 = vmatpush1.bf16.xpose.msra.mxu0 %v668_v5 }
  0xd1   : > { %671 = vmatprep.subr.bf16.mxu0 %v670_v6 }
  0xd8   : > { %673 = vmatpush1.bf16.xpose.msra.mxu0 %v672_v11 }
  0xd9   : > { %675 = vmatprep.subr.bf16.mxu0 %v674_v12 }
  0xe0   : > { %677 = vmatpush1.bf16.xpose.msra.mxu0 %v676_v17 }
  0xe1   : > { %679 = vmatprep.subr.bf16.mxu0 %v678_v18 }
  0xe8   : > { %681 = vmatpush1.bf16.xpose.msra.mxu0 %v680_v23 }
  0xe9   : > { %683 = vmatprep.subr.bf16.mxu0 %v682_v24 }
  0xf0   : > { %685 = vmatpush1.bf16.xpose.msra.mxu0 %v684_v29 }
  0xf1   : > { %687 = vmatprep.subr.bf16.mxu0 %v686_v30 }
  0xf8   : > { %689 = vmatpush1.bf16.xpose.msra.mxu0 %v688_v33 }
  0xff   : > { %419 = vmatmul.mubr.f32.vlgmr.msra.gmra.mrb[0].mxu0 %v288_v34 }
 0x1d0   : > { %432 = sbr.rel (%p617_p13) target bundleno = 484 (0x1e4), region = 48 }
 0x1d2   : > { %v420_v37 = vpop.f32.mrb[0].mxu0 }
 0x1d3   : > { %v425_v38 = vadd.f32 %v420_v37, %v286_v35  ;;  %v422_v39 = vpop.f32.mrb[1].mxu0 }
 0x1d4   : > { %v426_v40 = vadd.f32 %v422_v39, %v287_v36 }
 0x1d5   : > { %427 = vst [vmem:[#allocation2] sm:$0xff] %v425_v38 }
 0x1d6   : > { %428 = vst [vmem:[#allocation2 + $0x8] sm:$0xff] %v426_v40 }
 0x1dc   : > { %v433_v46 = vld [vmem:[#allocation2] sm:$0xff] }
 0x1dd   : > { %v434_v47 = vld [vmem:[#allocation2 + $0x8] sm:$0xff]  ;;  %v447_v50 = vadd.f32 %v440_v48, %v433_v46 }
 0x1de   : > { %v448_v51 = vadd.f32 %v444_v49, %v434_v47 }
 0x1df   : > { %vm449_vm0 = vcmp.gt.f32.partialorder %v447_v50, 0.0  ;;  %v451_v52 = vmul.f32 0.2, %v447_v50 }
 0x1e0   : > { %vm450_vm1 = vcmp.gt.f32.partialorder %v448_v51, 0.0  ;;  %v452_v53 = vmul.f32 0.2, %v448_v51 }
 0x1e1   : > { %v453_v54 = vsel %vm449_vm0, %v447_v50, %v451_v52 }
 0x1e2   : > { %v454_v55 = vsel %vm450_vm1, %v448_v51, %v452_v53  ;;  %455 = vst [vmem:[%s1333_s0] sm:$0xff] %v453_v54 }
 0x1e3   : > { %456 = vst [vmem:[%s1333_s0 + $0x8] sm:$0xff] %v454_v55 }
 0x1e4 PF: > { %s625_s21 = sshll.u32 %s1023_s22, 8  ;;  %s474_s29 = sshll.u32 %s1333_s0, 4  ;;  %s475_s29 = int_to_ptr.vmem [resolvable:$true] %s474_s29 }
 0x1e5   : > { %s1416_s4 = scalar_lea.hbm %s1493_s3, %s625_s21  ;;  %s458_s28 = scalar_lea.sflag [#allocation5], %s268_s7 }
 0x1e6   : > { %s885_s14 = scalar_lea.vmem %s475_s29, 256  ;;  %p1527_p12 = scmp.ne.s32.totalorder %s1517_s9, 0 }
 0x1e7   : > { %p886_p2 = scmp.ne.s32.totalorder %s475_s29, %s885_s14  ;;  %s1043_s26 = smov [#allocation8]  }
 0x1e8   : > { %s889_s30 = sshll.u32 %s1043_s26, 4  ;;  %s890_s30 = int_to_ptr.vmem [resolvable:$false] %s889_s30 }
 0x1e9   : > { %p887_p6 = pnand %p886_p2, %p1527_p12  ;;  %s891_s11 = scalar_lea.vmem %s890_s30, 512 }
 0x1ea   : > { %p892_p8 = scmp.lt.s32.totalorder %s475_s29, %s890_s30  ;;  %p893_p10 = scmp.lt.s32.totalorder %s891_s11, %s885_s14 }
 0x1eb   : > { %p888_p9 = pneg %p887_p6 }
 0x1ec   : > { %p894_p7 = por %p893_p10, %p892_p8 }
 0x1ee   : > { %p895_p1 = pnand %p894_p7, %p888_p9 }
 0x1f0   : > { %898 = shalt.err (!%p895_p1)
}
 0x1f1   : > { %s899_s22 = scalar_lea.hbm %s1416_s4, 256  ;;  %s903_s20 = scalar_lea.hbm %s1493_s3, 512 }
 0x1f2   : > { %p900_p3 = scmp.ne.s32.totalorder %s1416_s4, %s899_s22  ;;  %p904_p4 = scmp.lt.u32.totalorder %s1416_s4, %s1493_s3 }
 0x1f3   : > { %p905_p5 = scmp.lt.u32.totalorder %s903_s20, %s899_s22  ;;  %p907_p2 = scmp.lt.u32.totalorder %s899_s22, %s1416_s4 }
 0x1f4   : > { %p901_p0 = pnand %p900_p3, %p1527_p12 }
 0x1f5   : > { %p906_p13 = por %p905_p5, %p904_p4 }
 0x1f6   : > { %p902_p11 = pneg %p901_p0 }
 0x1f7   : > { %p908_p6 = por %p907_p2, %p906_p13 }
 0x1f9   : > { %p909_p9 = pnand %p908_p6, %p902_p11 }
 0x1fb   : > { %912 = shalt.err (!%p909_p9)
}
 0x1fc   : > { %694 = dma.vmem_to_hbm [thread:$0]  (%p1527_p12), %s475_s29, 256, %s1416_s4, %s458_s28  }
 0x1fd PF: > { %p708_p8 = scmp.ge.s32.totalorder %s1035_s25, 2  ;;  %s486_s0 = sand.u32 1, %s983_s12  }
 0x1fe   : > { %p1528_p10 = scmp.ne.s32.totalorder %s1518_s6, 0  ;;  %s487_s27 = scalar_lea.sflag [#allocation5], %s486_s0 }
 0x200   : > { %p704_p7 = pnand %p708_p8, %p1528_p10 }
 0x202   : > { %978 = dma.done.wait (!%p704_p7), %s487_s27, 256  }
 0x203   : > { %980 = vsyncadd (!%p704_p7), %s487_s27, 4294967040  ;;  %s22_s25 = sadd.s32 1, %s1035_s25   ;;  %s1530_s9 = sld [smem:[#allocation12_spill]] }
 0x204   : > { %p1443_p1 = scmp.ge.s32.totalorder %s22_s25, 6   ;;  %s1531_s14 = sld [smem:[#allocation19_spill]] }
 0x205   : > { %s1532_s21 = sld [smem:[#allocation18_spill]]  ;;  %s1533_s10 = sld [smem:[#allocation13_spill]] }
 0x206   : > { %s1534_s20 = sld [smem:[#allocation17_spill]]  ;;  %s1535_s22 = sld [smem:[#allocation14_spill]] }
 0x207   : > { %s1536_s6 = sld [smem:[#allocation15_spill]]  ;;  %s1537_s24 = sld [smem:[#allocation16_spill]] }
 0x208   : > { %s1539_s12 = smov %s987_s13  ;;  %s1541_s15 = smov %s999_s16 }
 0x209   : > { %s1540_s13 = smov %s1530_s9  ;;  %s1542_s16 = smov %s1003_s17 }
 0x20a   : > { %s1544_s18 = smov %s1011_s19  ;;  %21 = sbr.rel (!%p1443_p1) target bundleno = 14 (0xe), region = 101 }
 0x20b   : > { %s1543_s17 = smov %s1532_s21  ;;  %s1545_s19 = smov %s1533_s10 }
 0x20c   : > { %s1546_s21 = smov %s1027_s23 }
 0x20d   : > { %s1547_s23 = smov %s1536_s6 }
 0x211   :  { %492 = vsyncpa [#allocation4], 1 }
 0x212   :  { %494 = vsyncpa [#allocation4 + $0x1], 1 }
 0x213   :  { %495 = vsyncpa [#allocation7], 1 }
 0x214   :  { %497 = vsyncpa [#allocation7 + $0x1], 1 }
 0x215   :  { %498 = vsyncpa [#allocation5], 1 }
 0x216   :  { %500 = vsyncpa [#allocation5 + $0x1], 1 }

</bundles_post_ra>
